<compile_context>
chip_gen: v6e
topology: v6e:2x2x1
jax: 0.10.0
libtpu: 0.0.40
codegen_flags: <defaults>
</compile_context>

<pallas_src>
import numpy as np
import jax
import jax.numpy as jnp
from jax import lax
from jax.experimental import pallas as pl
from jax.experimental.pallas import tpu as pltpu

CLS_NUM_LIST = [45000, 5000]
MAX_M = 0.5
S = 30.0


def _make_m_list(cls_num_list, max_m):
    m = 1.0 / np.sqrt(np.sqrt(np.asarray(cls_num_list, dtype=np.float64)))
    m = m * (max_m / np.max(m))
    return jnp.asarray(m, dtype=jnp.float32)[None, :]  # (1, C)


def _vmem_capacity_bytes():
    try:
        info = pltpu.get_tpu_info()
        cap = int(getattr(info, "vmem_capacity_bytes", 0))
        if cap > 0:
            return cap
    except Exception:
        pass
    return 64 * 1024 * 1024  # conservative default (v7x per-core VMEM)


def _pick_block_rows(total_rows, vmem_cap):
    """Rows (of 128 lanes) per grid step.

    Double-buffered VMEM per row: x f32 (512 B) + out f32 (512 B) + tgt int8
    (128 B), two buffers each => 2304 B/row.  Budget ~40% of physical VMEM
    (capped at 48 MiB) so the pipeline is deep on v5e/v6e (128 MiB) and safe on
    v7x (64 MiB per core)."""
    bytes_per_row = 2 * (512 + 512 + 128)
    budget = min(vmem_cap * 2 // 5, 48 * 1024 * 1024)
    br = max(8, budget // bytes_per_row)
    br = min(br, 4096)                  # 4096 rows = 256K samples/step (~9 MiB VMEM)
    if br >= total_rows:
        return int(total_rows)          # single full-extent block (always legal)
    return int(max(8, (br // 8) * 8))   # sublane-aligned partial tiling


def ldam_loss(x, target, m_list, class_weight):
    """x: (N, 2) f32 logits; target: (N,) int; m_list / class_weight: (1, 2) f32.

    Returns (weighted-mean CE loss scalar, margin-adjusted logits (N, 2))."""
    N, C = x.shape
    assert C == 2, "kernel is specialized for the module's 2-class cls_num_list"
    total = N * C                                        # elements of the flat view

    x = x.astype(jnp.float32)
    # per-element (interleaved) target as int8 -> 1 byte/element of DMA traffic
    tgt2 = jnp.broadcast_to(target.astype(jnp.int8)[:, None], (N, C))

    if total % 128 == 0:
        # Fast path (N % 64 == 0): pure bitcast reshapes, zero wrapper copies.
        rows = total // 128
        x2d = x.reshape(rows, 128)
        t2d = tgt2.reshape(rows, 128)
        padded = False
    else:
        # Ragged batch: pad the flat view to whole 128-lane rows (tiny for the
        # demo; real training batches hit the copy-free path above).
        rows = -(-total // 128)
        pad = rows * 128 - total
        x2d = jnp.pad(x.reshape(-1), (0, pad)).reshape(rows, 128)
        t2d = jnp.pad(tgt2.reshape(-1), (0, pad)).reshape(rows, 128)
        padded = True

    m_vec = jnp.asarray(m_list, jnp.float32).reshape(-1)        # (2,) -> SMEM
    w_vec = jnp.asarray(class_weight, jnp.float32).reshape(-1)  # (2,) -> SMEM

    cap = _vmem_capacity_bytes()
    block_rows = _pick_block_rows(rows, cap)
    g = -(-rows // block_rows)
    work = 2 * block_rows * (512 + 512 + 128)
    vmem_limit = int(min(cap * 3 // 5, max(32 * 1024 * 1024, 2 * work)))

    def kernel(x_ref, tgt_ref, m_ref, w_ref, out_ref, part_ref):
        x_blk = x_ref[...]                                   # (BR, 128) f32
        tgt = tgt_ref[...].astype(jnp.int32)                 # int8 -> int32
        m0, m1 = m_ref[0], m_ref[1]                          # SMEM scalars
        w0, w1 = w_ref[0], w_ref[1]

        shape = x_blk.shape
        lane = lax.broadcasted_iota(jnp.int32, shape, 1)
        row = lax.broadcasted_iota(jnp.int32, shape, 0)
        cls = lane & 1                                       # class id of element
        cls1 = cls == 1

        sel = cls == tgt                                     # one_hot(target) mask
        sel_f = sel.astype(jnp.float32)

        m_c = jnp.where(cls1, m1, m0)                        # margin of this class
        w_c = jnp.where(cls1, w1, w0)                        # weight of this class

        # output = where(one_hot, x - m[target], x) == x - m[class] * one_hot
        output = x_blk - m_c * sel_f
        out_ref[...] = output                                # lane-dense, natural layout

        # element validity (ragged tail + Pallas partial-block padding)
        flat = (pl.program_id(0) * block_rows + row) * 128 + lane
        take = jnp.logical_and(sel, flat < total)
        take_f = take.astype(jnp.float32)

        # Other-class logit of the same sample sits in the adjacent lane; pick
        # between the two single-step rotations with a rolled pair-id compare
        # (XLU only, independent of pltpu.roll's direction convention).
        pid = (lane >> 1).astype(jnp.float32)
        part_a = pltpu.roll(output, 1, 1)
        part_b = pltpu.roll(output, 127, 1)
        partner = jnp.where(pltpu.roll(pid, 1, 1) == pid, part_a, part_b)

        # binary weighted CE: ce = softplus(s * (z_other - z_true)), stable form
        d = jnp.where(take, S * (partner - output), 0.0)
        ce = jnp.maximum(d, 0.0) + jnp.log(1.0 + jnp.exp(-jnp.abs(d)))

        part_ref[0, 0] = jnp.sum(take_f * w_c * ce)          # numerator partial
        part_ref[0, 1] = jnp.sum(take_f * w_c)               # denominator partial

    out2d, parts = pl.pallas_call(
        kernel,
        grid=(g,),
        out_shape=(
            jax.ShapeDtypeStruct((rows, 128), jnp.float32),   # margin-adjusted logits
            jax.ShapeDtypeStruct((g, 2), jnp.float32),        # per-block (num, den)
        ),
        in_specs=[
            pl.BlockSpec((block_rows, 128), lambda i: (i, 0)),   # x (interleaved)
            pl.BlockSpec((block_rows, 128), lambda i: (i, 0)),   # target (int8)
            pl.BlockSpec(memory_space=pltpu.MemorySpace.SMEM),   # m_list (2 scalars)
            pl.BlockSpec(memory_space=pltpu.MemorySpace.SMEM),   # class weights
        ],
        out_specs=(
            pl.BlockSpec((block_rows, 128), lambda i: (i, 0)),
            pl.BlockSpec((1, 2), lambda i: (i, 0),
                         memory_space=pltpu.MemorySpace.SMEM),
        ),
        compiler_params=pltpu.CompilerParams(
            dimension_semantics=("parallel",),
            vmem_limit_bytes=vmem_limit,
        ),
        cost_estimate=pl.CostEstimate(
            flops=int(20 * rows * 128),
            transcendentals=int(2 * rows * 128),
            bytes_accessed=int(9 * rows * 128 + 8 * g + 16),
        ),
    )(x2d, t2d, m_vec, w_vec)

    loss = jnp.sum(parts[:, 0]) / jnp.sum(parts[:, 1])
    if padded:
        output = out2d.reshape(-1)[:total].reshape(N, C)
    else:
        output = out2d.reshape(N, C)          # free bitcast reshape back
    return loss, output


def _reference(x, target, m_list, class_weight):
    N, C = x.shape
    index = jax.nn.one_hot(target, C, dtype=jnp.float32)
    batch_m = jnp.sum(m_list * index, axis=1, keepdims=True)
    output = jnp.where(index > 0, x - batch_m, x)
    logits = S * output
    logp = jax.nn.log_softmax(logits, axis=-1)
    ce = -jnp.take_along_axis(logp, target[:, None], axis=1)[:, 0]
    w_y = class_weight[0, target]
    loss = jnp.sum(w_y * ce) / jnp.sum(w_y)
    return loss, output


if __name__ == "__main__":
    key = jax.random.PRNGKey(0)
    N, C = 8, len(CLS_NUM_LIST)          # batch=8, 2 classes (from cls_num_list)

    kx, kt = jax.random.split(key)
    x = jax.random.normal(kx, (N, C), dtype=jnp.float32)
    target = jax.random.randint(kt, (N,), 0, C, dtype=jnp.int32)

    m_list = _make_m_list(CLS_NUM_LIST, MAX_M)                     # (1, C)
    class_weight = jnp.asarray(
        np.linspace(1.0, 2.0, C, dtype=np.float32))[None, :]       # (1, C)

    loss, output = ldam_loss(x, target, m_list, class_weight)
    jax.block_until_ready((loss, output))

    ref_loss, ref_out = _reference(x, target, m_list, class_weight)
    assert jnp.allclose(loss, ref_loss, atol=1e-4, rtol=1e-4), (loss, ref_loss)
    assert jnp.allclose(output, ref_out, atol=1e-5, rtol=1e-5)

    print("KERNEL_OK")
</pallas_src>

<mosaic_0001>
module attributes {stable_mosaic.version = 11 : i64} {
  func.func @kernel(%arg0: i32, %arg1: memref<1x128xf32, #tpu.memory_space<vmem>>, %arg2: memref<1x128xi8, #tpu.memory_space<vmem>>, %arg3: memref<2xf32, #tpu.memory_space<smem>>, %arg4: memref<2xf32, #tpu.memory_space<smem>>, %arg5: memref<1x128xf32, #tpu.memory_space<vmem>>, %arg6: memref<1x2xf32, #tpu.memory_space<smem>>) attributes {dimension_semantics = [#tpu.dimension_semantics<parallel>], iteration_bounds = array<i64: 1>, scalar_prefetch = 0 : i64, scratch_operands = 0 : i64, tpu.core_type = #tpu.core_type<tc>, window_params = [{transform_indices = @transform_0, window_bounds = array<i64: 1, 128>}, {transform_indices = @transform_1, window_bounds = array<i64: 1, 128>}, {transform_indices = @transform_2, window_bounds = array<i64: 2>}, {transform_indices = @transform_3, window_bounds = array<i64: 2>}, {transform_indices = @transform_4, window_bounds = array<i64: 1, 128>}, {transform_indices = @transform_5, window_bounds = array<i64: 1, 2>}]} {
    %c0 = arith.constant 0 : index
    %c0_0 = arith.constant 0 : index
    %0 = vector.load %arg1[%c0, %c0_0] : memref<1x128xf32, #tpu.memory_space<vmem>>, vector<1x128xf32>
    %c0_1 = arith.constant 0 : index
    %c0_2 = arith.constant 0 : index
    %1 = vector.load %arg2[%c0_1, %c0_2] : memref<1x128xi8, #tpu.memory_space<vmem>>, vector<1x128xi8>
    %2 = arith.extsi %1 : vector<1x128xi8> to vector<1x128xi32>
    %c0_3 = arith.constant 0 : index
    %3 = memref.load %arg3[%c0_3] : memref<2xf32, #tpu.memory_space<smem>>
    %c1 = arith.constant 1 : index
    %4 = memref.load %arg3[%c1] : memref<2xf32, #tpu.memory_space<smem>>
    %c0_4 = arith.constant 0 : index
    %5 = memref.load %arg4[%c0_4] : memref<2xf32, #tpu.memory_space<smem>>
    %c1_5 = arith.constant 1 : index
    %6 = memref.load %arg4[%c1_5] : memref<2xf32, #tpu.memory_space<smem>>
    %7 = tpu.iota {dimensions = array<i32: 1>} : vector<1x128xi32>
    %8 = tpu.iota {dimensions = array<i32: 0>} : vector<1x128xi32>
    %c1_i32 = arith.constant 1 : i32
    %9 = vector.broadcast %c1_i32 : i32 to vector<1x128xi32>
    %10 = arith.andi %7, %9 : vector<1x128xi32>
    %c1_i32_6 = arith.constant 1 : i32
    %11 = vector.broadcast %c1_i32_6 : i32 to vector<1x128xi32>
    %12 = arith.cmpi eq, %10, %11 : vector<1x128xi32>
    %13 = arith.cmpi eq, %10, %2 : vector<1x128xi32>
    %14 = arith.extui %13 : vector<1x128xi1> to vector<1x128xi32>
    %15 = arith.sitofp %14 : vector<1x128xi32> to vector<1x128xf32>
    %16 = vector.broadcast %4 : f32 to vector<1x128xf32>
    %17 = vector.broadcast %3 : f32 to vector<1x128xf32>
    %18 = arith.select %12, %16, %17 : vector<1x128xi1>, vector<1x128xf32>
    %19 = vector.broadcast %6 : f32 to vector<1x128xf32>
    %20 = vector.broadcast %5 : f32 to vector<1x128xf32>
    %21 = arith.select %12, %19, %20 : vector<1x128xi1>, vector<1x128xf32>
    %22 = arith.mulf %18, %15 : vector<1x128xf32>
    %23 = arith.subf %0, %22 : vector<1x128xf32>
    %c0_7 = arith.constant 0 : index
    %c0_8 = arith.constant 0 : index
    %24 = vector.load %arg5[%c0_7, %c0_8] : memref<1x128xf32, #tpu.memory_space<vmem>>, vector<1x128xf32>
    tpu.vector_store %arg5[%c0_7, %c0_8], %23 {strides = array<i32>} : memref<1x128xf32, #tpu.memory_space<vmem>>, vector<1x128xf32>,
    %c1_i32_9 = arith.constant 1 : i32
    %25 = arith.muli %arg0, %c1_i32_9 : i32
    %26 = vector.broadcast %25 : i32 to vector<1x128xi32>
    %27 = arith.addi %26, %8 : vector<1x128xi32>
    %c128_i32 = arith.constant 128 : i32
    %28 = vector.broadcast %c128_i32 : i32 to vector<1x128xi32>
    %29 = arith.muli %27, %28 : vector<1x128xi32>
    %30 = arith.addi %29, %7 : vector<1x128xi32>
    %c16_i32 = arith.constant 16 : i32
    %31 = vector.broadcast %c16_i32 : i32 to vector<1x128xi32>
    %32 = arith.cmpi slt, %30, %31 : vector<1x128xi32>
    %33 = arith.andi %13, %32 : vector<1x128xi1>
    %34 = arith.extui %33 : vector<1x128xi1> to vector<1x128xi32>
    %35 = arith.sitofp %34 : vector<1x128xi32> to vector<1x128xf32>
    %c1_i32_10 = arith.constant 1 : i32
    %36 = vector.broadcast %c1_i32_10 : i32 to vector<1x128xi32>
    %37 = arith.shrsi %7, %36 : vector<1x128xi32>
    %38 = arith.sitofp %37 : vector<1x128xi32> to vector<1x128xf32>
    %c1_i32_11 = arith.constant 1 : i32
    %39 = tpu.dynamic_rotate %23 by %c1_i32_11 dim 1 : vector<1x128xf32>, i32 -> vector<1x128xf32>
    %c127_i32 = arith.constant 127 : i32
    %40 = tpu.dynamic_rotate %23 by %c127_i32 dim 1 : vector<1x128xf32>, i32 -> vector<1x128xf32>
    %c1_i32_12 = arith.constant 1 : i32
    %41 = tpu.dynamic_rotate %38 by %c1_i32_12 dim 1 : vector<1x128xf32>, i32 -> vector<1x128xf32>
    %42 = arith.cmpf oeq, %41, %38 : vector<1x128xf32>
    %43 = arith.select %42, %39, %40 : vector<1x128xi1>, vector<1x128xf32>
    %44 = arith.subf %43, %23 : vector<1x128xf32>
    %cst = arith.constant 3.000000e+01 : f32
    %45 = vector.broadcast %cst : f32 to vector<1x128xf32>
    %46 = arith.mulf %45, %44 : vector<1x128xf32>
    %cst_13 = arith.constant 0.000000e+00 : f32
    %47 = vector.broadcast %cst_13 : f32 to vector<1x128xf32>
    %48 = arith.select %33, %46, %47 : vector<1x128xi1>, vector<1x128xf32>
    %cst_14 = arith.constant 0.000000e+00 : f32
    %49 = vector.broadcast %cst_14 : f32 to vector<1x128xf32>
    %50 = arith.maximumf %48, %49 : vector<1x128xf32>
    %51 = math.absf %48 : vector<1x128xf32>
    %cst_15 = arith.constant 0.000000e+00 : f32
    %52 = vector.broadcast %cst_15 : f32 to vector<1x128xf32>
    %53 = arith.subf %52, %51 : vector<1x128xf32>
    %54 = math.exp %53 : vector<1x128xf32>
    %cst_16 = arith.constant 1.000000e+00 : f32
    %55 = vector.broadcast %cst_16 : f32 to vector<1x128xf32>
    %56 = arith.addf %55, %54 : vector<1x128xf32>
    %57 = math.log %56 : vector<1x128xf32>
    %58 = arith.addf %50, %57 : vector<1x128xf32>
    %59 = arith.mulf %35, %21 : vector<1x128xf32>
    %60 = arith.mulf %59, %58 : vector<1x128xf32>
    %61 = vector.shape_cast %60 : vector<1x128xf32> to vector<1x1x128xf32>
    %cst_17 = arith.constant dense<0.000000e+00> : vector<1xf32>
    %62 = vector.multi_reduction <add>, %61, %cst_17 [1, 2] : vector<1x1x128xf32> to vector<1xf32>
    %63 = vector.shape_cast %62 : vector<1xf32> to vector<1x1x1xf32>
    %64 = vector.extract %63[0, 0, 0] : f32 from vector<1x1x1xf32>
    %c0_18 = arith.constant 0 : index
    %c0_19 = arith.constant 0 : index
    %65 = memref.load %arg6[%c0_18, %c0_19] : memref<1x2xf32, #tpu.memory_space<smem>>
    memref.store %64, %arg6[%c0_18, %c0_19] : memref<1x2xf32, #tpu.memory_space<smem>>
    %66 = arith.mulf %35, %21 : vector<1x128xf32>
    %67 = vector.shape_cast %66 : vector<1x128xf32> to vector<1x1x128xf32>
    %cst_20 = arith.constant dense<0.000000e+00> : vector<1xf32>
    %68 = vector.multi_reduction <add>, %67, %cst_20 [1, 2] : vector<1x1x128xf32> to vector<1xf32>
    %69 = vector.shape_cast %68 : vector<1xf32> to vector<1x1x1xf32>
    %70 = vector.extract %69[0, 0, 0] : f32 from vector<1x1x1xf32>
    %c0_21 = arith.constant 0 : index
    %c1_22 = arith.constant 1 : index
    %71 = memref.load %arg6[%c0_21, %c1_22] : memref<1x2xf32, #tpu.memory_space<smem>>
    memref.store %70, %arg6[%c0_21, %c1_22] : memref<1x2xf32, #tpu.memory_space<smem>>
    return
  }
  func.func @transform_0(%arg0: i32) -> (i32, i32) {
    %c0_i32 = arith.constant 0 : i32
    %c0_i32_0 = arith.constant 0 : i32
    return %arg0, %c0_i32 : i32, i32
  }
  func.func @transform_1(%arg0: i32) -> (i32, i32) {
    %c0_i32 = arith.constant 0 : i32
    %c0_i32_0 = arith.constant 0 : i32
    return %arg0, %c0_i32 : i32, i32
  }
  func.func @transform_2(%arg0: i32) -> i32 {
    %c0_i32 = arith.constant 0 : i32
    %c0_i32_0 = arith.constant 0 : i32
    return %c0_i32 : i32
  }
  func.func @transform_3(%arg0: i32) -> i32 {
    %c0_i32 = arith.constant 0 : i32
    %c0_i32_0 = arith.constant 0 : i32
    return %c0_i32 : i32
  }
  func.func @transform_4(%arg0: i32) -> (i32, i32) {
    %c0_i32 = arith.constant 0 : i32
    %c0_i32_0 = arith.constant 0 : i32
    return %arg0, %c0_i32 : i32, i32
  }
  func.func @transform_5(%arg0: i32) -> (i32, i32) {
    %c0_i32 = arith.constant 0 : i32
    %c0_i32_0 = arith.constant 0 : i32
    return %arg0, %c0_i32 : i32, i32
  }
}

</mosaic_0001>

<bundles_post_ra>
// kernel: tpu_custom_call.1
= control target key start
LH: loop header
LB: loop body
LE: loop exit
PB: predicated region body
PF: predicated region fallthrough
CT: control target
= control target key end

     0   :  { %11 = vsyncpa [#allocation3], 0  ;;  %s346_s0 = inlined_call_operand.hbm [shape: f32[1,128], index: 0, kind: input, shape index: {}]   ;;  %s347_s1 = inlined_call_operand.vmem [shape: s8[1,128], index: 1, kind: input, shape index: {}]   ;;  %s348_s2 = inlined_call_operand.vmem [shape: f32[2], index: 2, kind: input, shape index: {}]   ;;  %s349_s3 = inlined_call_operand.vmem [shape: f32[2], index: 3, kind: input, shape index: {}]   ;;  %s350_s4 = inlined_call_operand.hbm [shape: f32[1,128], index: 4, kind: output, shape index: {0}]   ;;  %s351_s5 = inlined_call_operand.hbm [shape: f32[1,2], index: 5, kind: output, shape index: {1}]  }
   0x1   :  { %12 = vsyncpa [#allocation6], 0 }
   0x2   :  { %13 = vsyncpa [#allocation9], 0 }
   0x3   :  { %14 = vsyncpa [#allocation4], 0 }
   0x4   :  { %15 = vsyncpa [#allocation5], 0  ;;  %s34_s20 = sshll.u32 %s348_s2, 4  ;;  %s272_s21 = smov [#allocation2]   ;;  %s35_s20 = int_to_ptr.vmem [resolvable:$true] %s34_s20 }
   0x5   :  { %s22_s22 = sshll.u32 %s272_s21, 4  ;;  %s23_s22 = int_to_ptr.vmem [resolvable:$true] %s22_s22 }
   0x6   :  { %s198_s23 = scalar_lea.vmem %s23_s22, 16  ;;  %s202_s24 = scalar_lea.vmem %s23_s22, 32 }
   0x7   :  { %p199_p0 = scmp.ne.s32.totalorder %s23_s22, %s198_s23  ;;  %p203_p1 = scmp.lt.s32.totalorder %s23_s22, %s23_s22 }
   0x8   :  { %p204_p2 = scmp.lt.s32.totalorder %s202_s24, %s198_s23 }
   0xa   :  { %p205_p3 = por %p204_p2, %p203_p1 }
   0xc   :  { %p206_p4 = pnand %p205_p3, %p199_p0 }
   0xe   :  { %209 = shalt.err (!%p206_p4)
}
   0xf   :  { %25 = dma.hbm_to_vmem [thread:$0]  %s346_s0, 16, %s23_s22, [#allocation3]  }
  0x10   :  { %s210_s27 = scalar_lea.vmem %s35_s20, 16  ;;  %p215_p6 = scmp.lt.s32.totalorder %s35_s20, %s35_s20 }
  0x11   :  { %p211_p5 = scmp.ne.s32.totalorder %s35_s20, %s210_s27  ;;  %p216_p7 = scmp.lt.s32.totalorder %s210_s27, %s210_s27 }
  0x13   :  { %p217_p8 = por %p216_p7, %p215_p6 }
  0x15   :  { %p218_p9 = pnand %p217_p8, %p211_p5 }
  0x17   :  { %221 = shalt.err (!%p218_p9)
}
  0x18   :  { %s273_s2 = smov [#allocation7]   ;;  %s44_s30 = sshll.u32 %s349_s3, 4  ;;  %s45_s30 = int_to_ptr.vmem [resolvable:$true] %s44_s30 }
  0x19   :  { %37 = dma.vmem_to_smem %s35_s20, 16, %s273_s2, [#allocation6]  }
  0x1a   :  { %s222_s6 = scalar_lea.vmem %s45_s30, 16  ;;  %p227_p11 = scmp.lt.s32.totalorder %s45_s30, %s45_s30 }
  0x1b   :  { %p223_p10 = scmp.ne.s32.totalorder %s45_s30, %s222_s6  ;;  %p228_p12 = scmp.lt.s32.totalorder %s222_s6, %s222_s6 }
  0x1d   :  { %p229_p13 = por %p228_p12, %p227_p11 }
  0x1f   :  { %p230_p0 = pnand %p229_p13, %p223_p10 }
  0x21   :  { %233 = shalt.err (!%p230_p0)
}
  0x22   :  { %s274_s0 = smov [#allocation8]  }
  0x23   :  { %47 = dma.vmem_to_smem %s45_s30, 16, %s274_s0, [#allocation9]  }
  0x24   :  { %262 = dma.done.wait [#allocation3], 16  }
  0x25   :  { %263 = vsyncadd [#allocation3], 4294967280 }
  0x26   :  { %264 = dma.done.wait [#allocation6], 16  }
  0x27   :  { %265 = vsyncadd [#allocation6], 4294967280 }
  0x28   :  { %266 = dma.done.wait [#allocation9], 16  }
  0x29   :  { %267 = vsyncadd [#allocation9], 4294967280 }
  0x2a   :  { %57 = sfence }
  0x2b   :  { %v65_v0 = vlaneseq  ;;  %v59_v1 = vld [vmem:[%s347_s1] sm:$0x1]  ;;  %s61_s8 = sld [smem:[#allocation7]]  ;;  %v275_v9 = vmov 0.0   ;;  %s276_s1 = smov 1   ;;  %vm115_vm4 = vcmask 1040384  }
  0x2c   :  { %v60_v3 = vunpack.c.0.s8 %v59_v1  ;;  %s170_s9 = sld [smem:[#allocation7 + $0x1]]  ;;  %v58_v13 = vld [vmem:[#allocation2] sm:$0x1]  ;;  %s277_s10 = smov 127  }
  0x2d   :  { %v66_v2 = vand.u32 127, %v65_v0  ;;  %v68_v17 = vshrl.u32 %v65_v0, 7  ;;  %s63_s11 = sld [smem:[#allocation8]]  ;;  %s278_s13 = smov [#allocation10]  }
  0x2e   :  { %s171_s12 = sld [smem:[#allocation8 + $0x1]]  ;;  %s146_s14 = sshll.u32 %s278_s13, 4  ;;  %s147_s14 = int_to_ptr.vmem [resolvable:$true] %s146_s14 }
  0x2f   :  { %v91_v4 = vshra.s32 %v66_v2, 1  ;;  %v69_v5 = vand.u32 1, %v66_v2  ;;  %v85_v18 = vmul.u32 128, %v68_v17  ;;  %s234_s15 = scalar_lea.vmem %s147_s14, 16  ;;  %s238_s16 = scalar_lea.vmem %s147_s14, 32 }
  0x30   :  { %p235_p1 = scmp.ne.s32.totalorder %s147_s14, %s234_s15  ;;  %p239_p2 = scmp.lt.s32.totalorder %s147_s14, %s147_s14 }
  0x31   :  { %v92_v6 = vcvt.s32.f32 %v91_v4  ;;  %vm322_vm0 = vcmp.eq.s32.totalorder %v69_v5, 1  ;;  %vm326_vm1 = vcmp.eq.s32.totalorder %v69_v5, %v60_v3  ;;  %v75_v11 = vstv %s61_s8  ;;  %p240_p3 = scmp.lt.s32.totalorder %s238_s16, %s234_s15 }
  0x32   :  { %v172_v10 = vsel %vm326_vm1, 1.0, %v275_v9  ;;  %v74_v12 = vstv %s170_s9  ;;  %v86_v19 = vadd.s32 %v85_v18, %v66_v2 }
  0x33   :  { %97 = vrot.lane.b32.xlu0 %v92_v6, %s276_s1  ;;  %v76_v14 = vsel %vm322_vm0, %v74_v12, %v75_v11  ;;  %v78_v21 = vstv %s63_s11  ;;  %p241_p4 = por %p240_p3, %p239_p2 }
  0x34   :  { %v80_v15 = vmul.f32 %v172_v10, %v76_v14  ;;  %vm87_vm2 = vcmp.lt.s32.totalorder %v86_v19, 16  ;;  %v77_v20 = vstv %s171_s12 }
  0x35   :  { %vm88_vm3 = vmand %vm326_vm1, %vm87_vm2  ;;  %v79_v22 = vsel %vm322_vm0, %v77_v20, %v78_v21  ;;  %p242_p5 = pnand %p241_p4, %p235_p1 }
  0x36   :  { %v81_v16 = vsub.f32 %v58_v13, %v80_v15  ;;  %v173_v23 = vsel %vm88_vm3, 1.0, %v275_v9 }
  0x37   :  { %v113_v24 = vmul.f32 %v173_v23, %v79_v22 }
  0x38   :  { %95 = vrot.lane.b32.xlu1 %v81_v16, %s277_s10  ;;  %82 = vst [vmem:[#allocation10] sm:$0x1] %v81_v16  ;;  %93 = vrot.lane.b32.xlu0 %v81_v16, %s276_s1 }
  0x39   :  { %v128_v25 = vsel %vm115_vm4, %v113_v24, 0.0 }
  0x57   :  { %129 = vadd.xlane.f32.xlu0 %v128_v25 }
  0xa5   :  { %v98_v26 = vpop.permute.xlu0 %97 }
  0xa6   :  { %vm99_vm5 = vcmp.eq.f32.partialorder %v98_v26, %v92_v6 }
  0xaa   :  { %v96_v27 = vpop.permute.xlu1 %95  ;;  %v94_v28 = vpop.permute.xlu0 %93 }
  0xab   :  { %v100_v29 = vsel %vm99_vm5, %v94_v28, %v96_v27 }
  0xac   :  { %v101_v30 = vsub.f32 %v100_v29, %v81_v16 }
  0xae   :  { %v102_v31 = vmul.f32 30.0, %v101_v30 }
  0xb0   :  { %v103_v32 = vsel %vm88_vm3, %v102_v31, 0.0 }
  0xb1   :  { %v105_v33 = vand.u32 2147483647, %v103_v32  ;;  %v104_v39 = vmax.f32 %v103_v32, 0.0 }
  0xb3   :  { %v106_v34 = vsub.f32 0.0, %v105_v33 }
  0xb5   :  { %v107_v35 = vmul.f32 1.442695, %v106_v34 }
  0xb7   :  { %186 = vpow2.f32 %v107_v35 }
  0xc4   :  { %v187_v36 = vpop.eup %186 }
  0xc5   :  { %v109_v37 = vadd.f32 1.0, %v187_v36 }
  0xc7   :  { %188 = vlog2.f32 %v109_v37 }
  0xd4   :  { %v189_v38 = vpop.eup %188 }
  0xd5   :  { %v111_v40 = vmul.f32 0.6931472, %v189_v38 }
  0xd7   :  { %v112_v41 = vadd.f32 %v111_v40, %v104_v39 }
  0xd9   :  { %v114_v42 = vmul.f32 %v113_v24, %v112_v41 }
  0xdb   :  { %v116_v43 = vsel %vm115_vm4, %v114_v42, 0.0 }
  0xdc   :  { %117 = vadd.xlane.f32.xlu1 %v116_v43 }
  0xdd   :  { %245 = shalt.err (!%p242_p5)
}
  0xde   :  { %149 = dma.vmem_to_hbm [thread:$0]  %s147_s14, 16, %s350_s4, [#allocation4]  }
  0xdf   :  { %s279_s4 = smov [#allocation11]  }
  0xe0   :  { %v130_v44 = vpop.xlane.xlu0 %129 }
  0xe1   :  { %v131_v45 = vrot.slane %v130_v44, 4 }
  0xe3   :  { %v132_v46 = vadd.f32 %v131_v45, %v130_v44 }
  0xe5   :  { %v133_v47 = vrot.slane %v132_v46, 2 }
  0xe7   :  { %v134_v51 = vadd.f32 %v133_v47, %v132_v46 }
  0xe9   :  { %v135_v54 = vrot.slane %v134_v51, 1 }
  0xeb   :  { %v136_v57 = vadd.f32 %v135_v54, %v134_v51 }
 0x165   :  { %v118_v48 = vpop.xlane.xlu1 %117 }
 0x166   :  { %v119_v49 = vrot.slane %v118_v48, 4 }
 0x168   :  { %v120_v50 = vadd.f32 %v119_v49, %v118_v48 }
 0x16a   :  { %v121_v52 = vrot.slane %v120_v50, 2 }
 0x16c   :  { %v122_v53 = vadd.f32 %v121_v52, %v120_v50 }
 0x16e   :  { %v123_v55 = vrot.slane %v122_v53, 1 }
 0x170   :  { %v124_v56 = vadd.f32 %v123_v55, %v122_v53 }
 0x172   :  { %174 = vpush %v124_v56 }
 0x173   :  { %176 = vpush %v136_v57 }
 0x1a3   :  { %s175_s19 = spop %174 }
 0x1a4   :  { %127 = sst [smem:[#allocation11]] %s175_s19  ;;  %s177_s20 = spop %176 }
 0x1a5   :  { %139 = sst [smem:[#allocation11 + $0x1]] %s177_s20 }
 0x1a6   :  { %157 = dma.smem_to_hbm %s279_s4, 16, %s351_s5, [#allocation5]  }
 0x1a7   :  { %268 = dma.done.wait [#allocation4], 16  }
 0x1a8   :  { %269 = vsyncadd [#allocation4], 4294967280 }
 0x1a9   :  { %270 = dma.done.wait [#allocation5], 16  }
 0x1aa   :  { %271 = vsyncadd [#allocation5], 4294967280 }
 0x1ab   :  { %164 = sfence }
 0x1ac   :  { %165 = vsyncpa [#allocation3], 1 }
 0x1ad   :  { %166 = vsyncpa [#allocation4], 1 }
 0x1ae   :  { %167 = vsyncpa [#allocation5], 1 }
 0x1af   :  { %168 = vsyncpa [#allocation6], 1 }
 0x1b0   :  { %169 = vsyncpa [#allocation9], 1 }

</bundles_post_ra>
